<compile_context>
chip_gen: v7x
topology: tpu7x:2x2x1
jax: 0.10.0
libtpu: 0.0.40
codegen_flags: <defaults>
</compile_context>

<pallas_src>
import functools

import jax
import jax.numpy as jnp
from jax.experimental import pallas as pl
from jax.experimental.pallas import tpu as pltpu

_LANES = 128
_SUBLANES = 8
_DEFAULT_BLOCK_BYTES_PER_INPUT = 2 * 1024 * 1024  # 2 MiB/input block (4096 f32 rows)


def _detect_tensorcore_splits():
    """Best-effort TensorCore count (2 on v7x-style chips); safe fallback 1."""
    try:
        info = pltpu.get_tpu_info()
    except Exception:
        return 1
    for name in ("num_cores", "num_tensorcores", "tensorcore_count", "cores_per_chip"):
        try:
            v = int(getattr(info, name))
        except (AttributeError, TypeError, ValueError):
            continue
        if 1 <= v <= 8:
            return v
    return 1


def _jaccard_kernel(p_ref, t_ref, inter_ref, total_ref, acc_i_ref, acc_s_ref, *,
                    rows, block_rows, mask_threshold):
    c = pl.program_id(0)                  # core-split index ("parallel")
    i = pl.program_id(1)                  # reduction step   ("arbitrary")
    bpc = pl.num_programs(1)
    blk = c * bpc + i                     # logical block id (may exceed last real block)

    @pl.when(i == 0)
    def _init():
        acc_i_ref[...] = jnp.zeros_like(acc_i_ref)
        acc_s_ref[...] = jnp.zeros_like(acc_s_ref)

    p = p_ref[...].astype(jnp.float32)
    t = t_ref[...].astype(jnp.float32)
    groups = block_rows // _SUBLANES

    def _fold(pv, tv):
        # Fold a (block_rows, 128) tile into the fixed (8, 128) accumulators:
        # layout-preserving leading-dim split + sum over axis 0 = pure VPU adds.
        prod = (pv * tv).reshape(groups, _SUBLANES, _LANES)
        ssum = (pv + tv).reshape(groups, _SUBLANES, _LANES)
        acc_i_ref[...] += jnp.sum(prod, axis=0)
        acc_s_ref[...] += jnp.sum(ssum, axis=0)

    if mask_threshold is None:
        # Every block is full and in range: no mask code on the hot path at all.
        _fold(p, t)
    else:
        @pl.when(blk < mask_threshold)
        def _fast():
            _fold(p, t)

        @pl.when(blk >= mask_threshold)
        def _masked():
            # Partial last block (valid in (0, block_rows)) or fully out-of-range
            # phantom block (valid <= 0).  OOB rows of the tile are undefined, so
            # zero them before accumulating.
            valid = rows - blk * block_rows
            row_ids = jax.lax.broadcasted_iota(jnp.int32, (block_rows, _LANES), 0)
            keep = row_ids < valid
            zero = jnp.zeros_like(p)
            _fold(jnp.where(keep, p, zero), jnp.where(keep, t, zero))

    @pl.when(i == bpc - 1)
    def _finalize():
        # Single XLU reduce per core, once.
        inter_ref[...] = jnp.sum(acc_i_ref[...]).reshape(1, 1, 1)
        total_ref[...] = jnp.sum(acc_s_ref[...]).reshape(1, 1, 1)


def binary_jaccard_loss(y_pred, y_true, eps=1e-07, *,
                        block_bytes_per_input=_DEFAULT_BLOCK_BYTES_PER_INPUT,
                        num_core_splits=None):
    """Pallas implementation of BinaryJaccardLoss.forward.

    Returns 1 - sum(p*t) / (sum(p+t) - sum(p*t) + eps) over the flattened inputs.
    """
    # TODO(synk): `threshold` / `zeros_and_ones` are not used in forward and are
    # not implemented here.
    assert y_pred.shape == y_true.shape
    p_flat = jnp.reshape(y_pred, (-1,))
    t_flat = jnp.reshape(y_true, (-1,))
    n = p_flat.shape[0]

    rem = n % _LANES
    main_n = n - rem

    if main_n == 0:
        # Degenerate: fewer than 128 elements total — plain jnp is optimal.
        p32 = p_flat.astype(jnp.float32)
        t32 = t_flat.astype(jnp.float32)
        inter = jnp.sum(p32 * t32)
        total = jnp.sum(p32 + t32)
        return 1.0 - inter / (total - inter + eps)

    # Main (128-aligned) part: free bitcast reshape when rem == 0.
    # TODO(synk): for ragged n the prefix slice still materializes one extra copy
    # of each input; a 1-D BlockSpec + in-kernel flat-index tail mask would make
    # the ragged path a single streaming pass as well.
    p_main = p_flat if rem == 0 else p_flat[:main_n]
    t_main = t_flat if rem == 0 else t_flat[:main_n]
    rows = main_n // _LANES
    p2 = jnp.reshape(p_main, (rows, _LANES))
    t2 = jnp.reshape(t_main, (rows, _LANES))

    if rows < _SUBLANES:
        # Tiny input: pad to one (8, 128) tile (<4 KiB per input, zeros are inert).
        pad_rows = _SUBLANES - rows
        p2 = jnp.pad(p2, ((0, pad_rows), (0, 0)))
        t2 = jnp.pad(t2, ((0, pad_rows), (0, 0)))
        rows = _SUBLANES

    ip = jnp.dtype(y_pred.dtype).itemsize
    it = jnp.dtype(y_true.dtype).itemsize
    itemsize = max(ip, it)

    # block_rows: multiple of 8 (for the (g,8,128) fold), never larger than rows,
    # sized from a per-input byte budget.
    pref_rows = max(_SUBLANES,
                    (block_bytes_per_input // (itemsize * _LANES)) // _SUBLANES * _SUBLANES)
    block_rows = min(pref_rows, (rows // _SUBLANES) * _SUBLANES)
    num_blocks = pl.cdiv(rows, block_rows)

    # Multi-TensorCore split (v7x); size-1 leading axis elsewhere is free.
    if num_core_splits is None:
        num_core_splits = _detect_tensorcore_splits()
    num_cores = max(1, min(int(num_core_splits), num_blocks))
    blocks_per_core = pl.cdiv(num_blocks, num_cores)
    total_blocks = num_cores * blocks_per_core

    # Masking policy (all static): blocks >= mask_threshold take the masked path.
    partial_last = (rows % block_rows) != 0
    threshold = num_blocks - 1 if partial_last else num_blocks
    mask_threshold = threshold if threshold < total_blocks else None

    # index_map: clamp only when the core split leaves phantom trailing blocks
    # (their DMA re-reads the last real block; the kernel masks them fully).
    if total_blocks == num_blocks:
        def in_map(c, i):
            return (c * blocks_per_core + i, 0)
    else:
        def in_map(c, i):
            return (jnp.minimum(c * blocks_per_core + i, num_blocks - 1), 0)

    both_block_bytes = (ip + it) * block_rows * _LANES
    vmem_limit = int(min(48 << 20, max(32 << 20, 8 * both_block_bytes)))

    cost = pl.CostEstimate(
        flops=4 * main_n,
        transcendentals=0,
        bytes_accessed=int((ip + it) * main_n + 8 * num_cores),
    )

    kernel = functools.partial(
        _jaccard_kernel, rows=rows, block_rows=block_rows, mask_threshold=mask_threshold)

    inter_parts, total_parts = pl.pallas_call(
        kernel,
        out_shape=(jax.ShapeDtypeStruct((num_cores, 1, 1), jnp.float32),
                   jax.ShapeDtypeStruct((num_cores, 1, 1), jnp.float32)),
        grid_spec=pltpu.PrefetchScalarGridSpec(
            num_scalar_prefetch=0,
            grid=(num_cores, blocks_per_core),
            in_specs=[
                pl.BlockSpec((block_rows, _LANES), in_map),
                pl.BlockSpec((block_rows, _LANES), in_map),
            ],
            out_specs=[
                pl.BlockSpec((1, 1, 1), lambda c, i: (c, 0, 0)),
                pl.BlockSpec((1, 1, 1), lambda c, i: (c, 0, 0)),
            ],
            scratch_shapes=[
                pltpu.VMEM((_SUBLANES, _LANES), jnp.float32),  # running sum(p*t)
                pltpu.VMEM((_SUBLANES, _LANES), jnp.float32),  # running sum(p+t)
            ],
        ),
        compiler_params=pltpu.CompilerParams(
            dimension_semantics=("parallel", "arbitrary"),
            vmem_limit_bytes=vmem_limit),
        cost_estimate=cost,
    )(p2, t2)

    inter = jnp.sum(inter_parts)
    total = jnp.sum(total_parts)

    if rem:
        # Sub-128 lane tail: tiny wrapper-side reduction (no padded copy of the inputs).
        pt = p_flat[main_n:].astype(jnp.float32)
        tt = t_flat[main_n:].astype(jnp.float32)
        inter = inter + jnp.sum(pt * tt)
        total = total + jnp.sum(pt + tt)

    union = total - inter
    return 1.0 - inter / (union + eps)


def _reference(y_pred, y_true, eps=1e-07):
    p = y_pred.reshape(-1).astype(jnp.float32)
    t = y_true.reshape(-1).astype(jnp.float32)
    inter = jnp.sum(p * t)
    union = jnp.sum(p + t) - inter
    return 1.0 - inter / (union + eps)


if __name__ == "__main__":
    key = jax.random.PRNGKey(0)
    ks = jax.random.split(key, 6)

    # Case 1: typical segmentation-like batch, n % 128 == 0 -> zero-copy single-block path.
    y_pred = jax.random.uniform(ks[0], (2, 4, 16, 16), dtype=jnp.float32)
    y_true = (jax.random.uniform(ks[1], (2, 4, 16, 16)) > 0.5).astype(jnp.float32)
    loss = binary_jaccard_loss(y_pred, y_true)
    jax.block_until_ready(loss)
    ref = _reference(y_pred, y_true)
    assert jnp.allclose(loss, ref, rtol=1e-5, atol=1e-5), (loss, ref)

    # Case 2: ragged element count + tiny blocks -> multi-step accumulation,
    # partial-last-block mask, and wrapper-side <128-element lane tail.
    y_pred2 = jax.random.uniform(ks[2], (3, 5, 17, 13), dtype=jnp.float32)
    y_true2 = (jax.random.uniform(ks[3], (3, 5, 17, 13)) > 0.5).astype(jnp.float32)
    loss2 = binary_jaccard_loss(y_pred2, y_true2,
                                block_bytes_per_input=_SUBLANES * _LANES * 4)
    jax.block_until_ready(loss2)
    ref2 = _reference(y_pred2, y_true2)
    assert jnp.allclose(loss2, ref2, rtol=1e-5, atol=1e-5), (loss2, ref2)

    # Case 3: forced 2-way core split with an odd block count -> exercises the
    # clamped index_map, fully-masked phantom block, and per-core partial combine
    # (runs sequentially and correctly on single-TensorCore chips too).
    y_pred3 = jax.random.uniform(ks[4], (8, 9, 128), dtype=jnp.float32)
    y_true3 = (jax.random.uniform(ks[5], (8, 9, 128)) > 0.5).astype(jnp.float32)
    loss3 = binary_jaccard_loss(y_pred3, y_true3,
                                block_bytes_per_input=_SUBLANES * _LANES * 4,
                                num_core_splits=2)
    jax.block_until_ready(loss3)
    ref3 = _reference(y_pred3, y_true3)
    assert jnp.allclose(loss3, ref3, rtol=1e-5, atol=1e-5), (loss3, ref3)

    print("KERNEL_OK")
</pallas_src>

<mosaic_0001>
module attributes {stable_mosaic.version = 11 : i64} {
  func.func @_jaccard_kernel(%arg0: i32, %arg1: i32, %arg2: memref<16x128xf32, #tpu.memory_space<vmem>>, %arg3: memref<16x128xf32, #tpu.memory_space<vmem>>, %arg4: memref<1x1x1xf32, #tpu.memory_space<vmem>>, %arg5: memref<1x1x1xf32, #tpu.memory_space<vmem>>, %arg6: memref<8x128xf32, #tpu.memory_space<vmem>>, %arg7: memref<8x128xf32, #tpu.memory_space<vmem>>) attributes {dimension_semantics = [#tpu.dimension_semantics<parallel>, #tpu.dimension_semantics<arbitrary>], iteration_bounds = array<i64: 1, 1>, scalar_prefetch = 0 : i64, scratch_operands = 2 : i64, tpu.core_type = #tpu.core_type<tc>, window_params = [{transform_indices = @transform_0, window_bounds = array<i64: 16, 128>}, {transform_indices = @transform_1, window_bounds = array<i64: 16, 128>}, {transform_indices = @transform_2, window_bounds = array<i64: 1, 1, 1>}, {transform_indices = @transform_3, window_bounds = array<i64: 1, 1, 1>}]} {
    %c0_i32 = arith.constant 0 : i32
    %0 = arith.cmpi eq, %arg1, %c0_i32 : i32
    %1 = arith.extui %0 : i1 to i32
    %c0_i32_0 = arith.constant 0 : i32
    %2 = arith.cmpi ne, %1, %c0_i32_0 : i32
    scf.if %2 {
      %cst_15 = arith.constant 0.000000e+00 : f32
      %20 = vector.broadcast %cst_15 : f32 to vector<8x128xf32>
      %c0_16 = arith.constant 0 : index
      %c0_17 = arith.constant 0 : index
      %21 = vector.load %arg6[%c0_16, %c0_17] : memref<8x128xf32, #tpu.memory_space<vmem>>, vector<8x128xf32>
      tpu.vector_store %arg6[%c0_16, %c0_17], %20 {strides = array<i32>} : memref<8x128xf32, #tpu.memory_space<vmem>>, vector<8x128xf32>,
      %cst_18 = arith.constant 0.000000e+00 : f32
      %22 = vector.broadcast %cst_18 : f32 to vector<8x128xf32>
      %c0_19 = arith.constant 0 : index
      %c0_20 = arith.constant 0 : index
      %23 = vector.load %arg7[%c0_19, %c0_20] : memref<8x128xf32, #tpu.memory_space<vmem>>, vector<8x128xf32>
      tpu.vector_store %arg7[%c0_19, %c0_20], %22 {strides = array<i32>} : memref<8x128xf32, #tpu.memory_space<vmem>>, vector<8x128xf32>,
    } else {
    }
    %c0 = arith.constant 0 : index
    %c0_1 = arith.constant 0 : index
    %3 = vector.load %arg2[%c0, %c0_1] : memref<16x128xf32, #tpu.memory_space<vmem>>, vector<16x128xf32>
    %c0_2 = arith.constant 0 : index
    %c0_3 = arith.constant 0 : index
    %4 = vector.load %arg3[%c0_2, %c0_3] : memref<16x128xf32, #tpu.memory_space<vmem>>, vector<16x128xf32>
    %5 = arith.mulf %3, %4 : vector<16x128xf32>
    %6 = vector.shape_cast %5 : vector<16x128xf32> to vector<2x8x128xf32>
    %7 = arith.addf %3, %4 : vector<16x128xf32>
    %8 = vector.shape_cast %7 : vector<16x128xf32> to vector<2x8x128xf32>
    %c0_4 = arith.constant 0 : index
    %c0_5 = arith.constant 0 : index
    %9 = vector.load %arg6[%c0_4, %c0_5] : memref<8x128xf32, #tpu.memory_space<vmem>>, vector<8x128xf32>
    %cst = arith.constant dense<0.000000e+00> : vector<8x128xf32>
    %10 = vector.multi_reduction <add>, %6, %cst [0] : vector<2x8x128xf32> to vector<8x128xf32>
    %11 = arith.addf %9, %10 : vector<8x128xf32>
    %c0_6 = arith.constant 0 : index
    %c0_7 = arith.constant 0 : index
    %12 = vector.load %arg6[%c0_6, %c0_7] : memref<8x128xf32, #tpu.memory_space<vmem>>, vector<8x128xf32>
    tpu.vector_store %arg6[%c0_6, %c0_7], %11 {strides = array<i32>} : memref<8x128xf32, #tpu.memory_space<vmem>>, vector<8x128xf32>,
    %c0_8 = arith.constant 0 : index
    %c0_9 = arith.constant 0 : index
    %13 = vector.load %arg7[%c0_8, %c0_9] : memref<8x128xf32, #tpu.memory_space<vmem>>, vector<8x128xf32>
    %cst_10 = arith.constant dense<0.000000e+00> : vector<8x128xf32>
    %14 = vector.multi_reduction <add>, %8, %cst_10 [0] : vector<2x8x128xf32> to vector<8x128xf32>
    %15 = arith.addf %13, %14 : vector<8x128xf32>
    %c0_11 = arith.constant 0 : index
    %c0_12 = arith.constant 0 : index
    %16 = vector.load %arg7[%c0_11, %c0_12] : memref<8x128xf32, #tpu.memory_space<vmem>>, vector<8x128xf32>
    tpu.vector_store %arg7[%c0_11, %c0_12], %15 {strides = array<i32>} : memref<8x128xf32, #tpu.memory_space<vmem>>, vector<8x128xf32>,
    %c0_i32_13 = arith.constant 0 : i32
    %17 = arith.cmpi eq, %arg1, %c0_i32_13 : i32
    %18 = arith.extui %17 : i1 to i32
    %c0_i32_14 = arith.constant 0 : i32
    %19 = arith.cmpi ne, %18, %c0_i32_14 : i32
    scf.if %19 {
      %c0_15 = arith.constant 0 : index
      %c0_16 = arith.constant 0 : index
      %20 = vector.load %arg6[%c0_15, %c0_16] : memref<8x128xf32, #tpu.memory_space<vmem>>, vector<8x128xf32>
      %21 = vector.shape_cast %20 : vector<8x128xf32> to vector<1x8x128xf32>
      %cst_17 = arith.constant dense<0.000000e+00> : vector<1xf32>
      %22 = vector.multi_reduction <add>, %21, %cst_17 [1, 2] : vector<1x8x128xf32> to vector<1xf32>
      %23 = vector.shape_cast %22 : vector<1xf32> to vector<1x1x1xf32>
      %24 = vector.extract %23[0, 0, 0] : f32 from vector<1x1x1xf32>
      %25 = vector.broadcast %24 : f32 to vector<1x1x1xf32>
      %c0_18 = arith.constant 0 : index
      %c0_19 = arith.constant 0 : index
      %c0_20 = arith.constant 0 : index
      %26 = vector.load %arg4[%c0_18, %c0_19, %c0_20] : memref<1x1x1xf32, #tpu.memory_space<vmem>>, vector<1x1x1xf32>
      tpu.vector_store %arg4[%c0_18, %c0_19, %c0_20], %25 {strides = array<i32>} : memref<1x1x1xf32, #tpu.memory_space<vmem>>, vector<1x1x1xf32>,
      %c0_21 = arith.constant 0 : index
      %c0_22 = arith.constant 0 : index
      %27 = vector.load %arg7[%c0_21, %c0_22] : memref<8x128xf32, #tpu.memory_space<vmem>>, vector<8x128xf32>
      %28 = vector.shape_cast %27 : vector<8x128xf32> to vector<1x8x128xf32>
      %cst_23 = arith.constant dense<0.000000e+00> : vector<1xf32>
      %29 = vector.multi_reduction <add>, %28, %cst_23 [1, 2] : vector<1x8x128xf32> to vector<1xf32>
      %30 = vector.shape_cast %29 : vector<1xf32> to vector<1x1x1xf32>
      %31 = vector.extract %30[0, 0, 0] : f32 from vector<1x1x1xf32>
      %32 = vector.broadcast %31 : f32 to vector<1x1x1xf32>
      %c0_24 = arith.constant 0 : index
      %c0_25 = arith.constant 0 : index
      %c0_26 = arith.constant 0 : index
      %33 = vector.load %arg5[%c0_24, %c0_25, %c0_26] : memref<1x1x1xf32, #tpu.memory_space<vmem>>, vector<1x1x1xf32>
      tpu.vector_store %arg5[%c0_24, %c0_25, %c0_26], %32 {strides = array<i32>} : memref<1x1x1xf32, #tpu.memory_space<vmem>>, vector<1x1x1xf32>,
    } else {
    }
    return
  }
  func.func @transform_0(%arg0: i32, %arg1: i32) -> (i32, i32) {
    %c1_i32 = arith.constant 1 : i32
    %0 = arith.muli %arg0, %c1_i32 : i32
    %1 = arith.addi %0, %arg1 : i32
    %c0_i32 = arith.constant 0 : i32
    %c0_i32_0 = arith.constant 0 : i32
    return %1, %c0_i32 : i32, i32
  }
  func.func @transform_1(%arg0: i32, %arg1: i32) -> (i32, i32) {
    %c1_i32 = arith.constant 1 : i32
    %0 = arith.muli %arg0, %c1_i32 : i32
    %1 = arith.addi %0, %arg1 : i32
    %c0_i32 = arith.constant 0 : i32
    %c0_i32_0 = arith.constant 0 : i32
    return %1, %c0_i32 : i32, i32
  }
  func.func @transform_2(%arg0: i32, %arg1: i32) -> (i32, i32, i32) {
    %c0_i32 = arith.constant 0 : i32
    %c0_i32_0 = arith.constant 0 : i32
    %c0_i32_1 = arith.constant 0 : i32
    return %arg0, %c0_i32, %c0_i32_0 : i32, i32, i32
  }
  func.func @transform_3(%arg0: i32, %arg1: i32) -> (i32, i32, i32) {
    %c0_i32 = arith.constant 0 : i32
    %c0_i32_0 = arith.constant 0 : i32
    %c0_i32_1 = arith.constant 0 : i32
    return %arg0, %c0_i32, %c0_i32_0 : i32, i32, i32
  }
}

</mosaic_0001>

<bundles_post_ra>
// kernel: tpu_custom_call.1
= control target key start
LH: loop header
LB: loop body
LE: loop exit
PB: predicated region body
PF: predicated region fallthrough
CT: control target
= control target key end

     0   :  { %9 = vsyncpa [#allocation5], 0  ;;  %s317_s0 = inlined_call_operand.hbm [shape: f32[16,128], index: 0, kind: input, shape index: {}]   ;;  %s318_s1 = inlined_call_operand.hbm [shape: f32[16,128], index: 1, kind: input, shape index: {}]   ;;  %s319_s2 = inlined_call_operand.hbm [shape: f32[1,1,1], index: 2, kind: output, shape index: {0}]   ;;  %s320_s3 = inlined_call_operand.hbm [shape: f32[1,1,1], index: 3, kind: output, shape index: {1}]  }
   0x1   :  { %10 = vsyncpa [#allocation8], 0 }
   0x2   :  { %11 = vsyncpa [#allocation6], 0 }
   0x3   :  { %12 = vsyncpa [#allocation11], 0  ;;  %s241_s12 = smov [#allocation4]   ;;  %s145_s16 = scalar_lea.hbm %s317_s0, 256 }
   0x4   :  { %s22_s13 = sshll.u32 %s241_s12, 4  ;;  %p146_p0 = scmp.ne.s32.totalorder %s317_s0, %s145_s16  ;;  %s23_s13 = int_to_ptr.vmem [resolvable:$true] %s22_s13 }
   0x5   :  { %p149_p1 = scmp.lt.u32.totalorder %s145_s16, %s317_s0 }
   0x7   :  { %p151_p2 = pnand %p149_p1, %p146_p0 }
   0x9   :  { %154 = shalt.err (!%p151_p2)
}
   0xa   :  { %s155_s21 = scalar_lea.vmem %s23_s13, 256  ;;  %p160_p4 = scmp.lt.s32.totalorder %s23_s13, %s23_s13 }
   0xb   :  { %p156_p3 = scmp.ne.s32.totalorder %s23_s13, %s155_s21  ;;  %p161_p5 = scmp.lt.s32.totalorder %s155_s21, %s155_s21 }
   0xd   :  { %p162_p6 = por %p161_p5, %p160_p4 }
   0xf   :  { %p163_p7 = pnand %p162_p6, %p156_p3 }
  0x11   :  { %166 = shalt.err (!%p163_p7)
}
  0x12   :  { %s242_s22 = smov 128   ;;  %s243_s23 = smov 8  }
  0x13   :  { %28 = dma.hbm_to_vmem [thread:$0]  %s317_s0, 256, %s23_s13, [#allocation5], %s242_s22, %s242_s22, %s243_s23  }
  0x14   :  { %s244_s26 = smov [#allocation7]   ;;  %s167_s30 = scalar_lea.hbm %s318_s1, 256 }
  0x15   :  { %s38_s27 = sshll.u32 %s244_s26, 4  ;;  %p168_p8 = scmp.ne.s32.totalorder %s318_s1, %s167_s30  ;;  %s39_s27 = int_to_ptr.vmem [resolvable:$true] %s38_s27 }
  0x16   :  { %p171_p9 = scmp.lt.u32.totalorder %s167_s30, %s318_s1 }
  0x18   :  { %p173_p10 = pnand %p171_p9, %p168_p8 }
  0x1a   :  { %176 = shalt.err (!%p173_p10)
}
  0x1b   :  { %s177_s8 = scalar_lea.vmem %s39_s27, 256  ;;  %p182_p12 = scmp.lt.s32.totalorder %s39_s27, %s39_s27 }
  0x1c   :  { %p178_p11 = scmp.ne.s32.totalorder %s39_s27, %s177_s8  ;;  %p183_p13 = scmp.lt.s32.totalorder %s177_s8, %s177_s8 }
  0x1e   :  { %p184_p0 = por %p183_p13, %p182_p12 }
  0x20   :  { %p185_p1 = pnand %p184_p0, %p178_p11 }
  0x22   :  { %188 = shalt.err (!%p185_p1)
}
  0x23   :  { %44 = dma.hbm_to_vmem [thread:$0]  %s318_s1, 256, %s39_s27, [#allocation8], %s242_s22, %s242_s22, %s243_s23  }
  0x24   :  { %233 = dma.done.wait [#allocation5], 256  }
  0x25   :  { %234 = vsyncadd [#allocation5], 4294967040 }
  0x26   :  { %235 = dma.done.wait [#allocation8], 256  }
  0x27   :  { %236 = vsyncadd [#allocation8], 4294967040  ;;  %v61_v0 = vld [vmem:[#allocation4] sm:$0xff]  ;;  %v62_v1 = vld [vmem:[#allocation4 + $0x8] sm:$0xff]  ;;  %s245_s1 = smov [#allocation9]   ;;  %vm91_vm0 = vcmask 0  }
  0x28   :  { %v63_v2 = vld [vmem:[#allocation7] sm:$0xff]  ;;  %v64_v3 = vld [vmem:[#allocation7 + $0x8] sm:$0xff]  ;;  %s111_s10 = sshll.u32 %s245_s1, 4  ;;  %s246_s12 = smov [#allocation10]   ;;  %s112_s10 = int_to_ptr.vmem [resolvable:$true] %s111_s10 }
  0x29   :  { %v65_v4 = vmul.f32 %v63_v2, %v61_v0  ;;  %v66_v5 = vmul.f32 %v64_v3, %v62_v1  ;;  %v67_v6 = vadd.f32 %v63_v2, %v61_v0  ;;  %v68_v7 = vadd.f32 %v64_v3, %v62_v1  ;;  %s121_s13 = sshll.u32 %s246_s12, 4  ;;  %s189_s14 = scalar_lea.vmem %s112_s10, 16  ;;  %s122_s13 = int_to_ptr.vmem [resolvable:$true] %s121_s13 }
  0x2a   :  { %p190_p2 = scmp.ne.s32.totalorder %s112_s10, %s189_s14  ;;  %s193_s15 = scalar_lea.vmem %s112_s10, 32 }
  0x2b   :  { %v70_v8 = vadd.f32 %v66_v5, %v65_v4  ;;  %v74_v9 = vadd.f32 %v68_v7, %v67_v6  ;;  %p194_p3 = scmp.lt.s32.totalorder %s112_s10, %s112_s10  ;;  %p195_p4 = scmp.lt.s32.totalorder %s193_s15, %s189_s14 }
  0x2d   :  { %81 = vadd.xlane.f32.xlu0 %v70_v8  ;;  %p196_p5 = por %p195_p4, %p194_p3 }
  0x2f   :  { %p197_p6 = pnand %p196_p5, %p190_p2 }
  0x31   :  { %94 = vadd.xlane.f32.xlu0 %v74_v9 }
  0xba   :  { %v82_v10 = vpop.xlane.xlu0 %81 }
  0xbb   :  { %v83_v11 = vrot.slane %v82_v10, 4 }
  0xbd   :  { %v84_v12 = vadd.f32 %v83_v11, %v82_v10 }
  0xbe   :  { %v95_v13 = vpop.xlane.xlu0 %94 }
  0xbf   :  { %v85_v14 = vrot.slane %v84_v12, 2  ;;  %v96_v15 = vrot.slane %v95_v13, 4 }
  0xc1   :  { %v97_v16 = vadd.f32 %v96_v15, %v95_v13  ;;  %v86_v17 = vadd.f32 %v85_v14, %v84_v12 }
  0xc3   :  { %v98_v18 = vrot.slane %v97_v16, 2  ;;  %v87_v19 = vrot.slane %v86_v17, 1 }
  0xc5   :  { %v99_v20 = vadd.f32 %v98_v18, %v97_v16  ;;  %v88_v21 = vadd.f32 %v87_v19, %v86_v17 }
  0xc7   :  { %135 = vpush %v88_v21  ;;  %v100_v22 = vrot.slane %v99_v20, 1 }
  0xc9   :  { %v101_v23 = vadd.f32 %v100_v22, %v99_v20 }
  0xcb   :  { %137 = vpush %v101_v23 }
  0xf8   :  { %s136_s11 = spop %135 }
  0xf9   :  { %v90_v24 = vstv %s136_s11 }
  0xfa   :  { %92 = vst.msk [vmem:[#allocation9] sm:$0x1] %vm91_vm0, %v90_v24 }
  0xfb   :  { %200 = shalt.err (!%p197_p6)
}
  0xfc   :  { %s201_s18 = scalar_lea.hbm %s319_s2, 16 }
  0xfd   :  { %p202_p7 = scmp.ne.s32.totalorder %s319_s2, %s201_s18  ;;  %p205_p8 = scmp.lt.u32.totalorder %s201_s18, %s319_s2 }
  0xff   :  { %p207_p9 = pnand %p205_p8, %p202_p7 }
 0x101   :  { %210 = shalt.err (!%p207_p9)
}
 0x102   :  { %114 = dma.vmem_to_hbm [thread:$0]  %s112_s10, 16, %s319_s2, [#allocation6]  }
 0x103   :  { %s138_s25 = spop %137  ;;  %s211_s26 = scalar_lea.vmem %s122_s13, 16 }
 0x104   :  { %v103_v25 = vstv %s138_s25  ;;  %p212_p10 = scmp.ne.s32.totalorder %s122_s13, %s211_s26  ;;  %s215_s27 = scalar_lea.vmem %s122_s13, 32 }
 0x105   :  { %104 = vst.msk [vmem:[#allocation10] sm:$0x1] %vm91_vm0, %v103_v25  ;;  %p216_p11 = scmp.lt.s32.totalorder %s122_s13, %s122_s13  ;;  %p217_p12 = scmp.lt.s32.totalorder %s215_s27, %s211_s26 }
 0x107   :  { %p218_p13 = por %p217_p12, %p216_p11 }
 0x109   :  { %p219_p0 = pnand %p218_p13, %p212_p10 }
 0x10b   :  { %222 = shalt.err (!%p219_p0)
}
 0x10c   :  { %s223_s30 = scalar_lea.hbm %s320_s3, 16 }
 0x10d   :  { %p224_p1 = scmp.ne.s32.totalorder %s320_s3, %s223_s30  ;;  %p227_p2 = scmp.lt.u32.totalorder %s223_s30, %s320_s3 }
 0x10f   :  { %p229_p3 = pnand %p227_p2, %p224_p1 }
 0x111   :  { %232 = shalt.err (!%p229_p3)
}
 0x112   :  { %124 = dma.vmem_to_hbm [thread:$0]  %s122_s13, 16, %s320_s3, [#allocation11]  }
 0x113   :  { %237 = dma.done.wait [#allocation6], 16  }
 0x114   :  { %238 = vsyncadd [#allocation6], 4294967280 }
 0x115   :  { %239 = dma.done.wait [#allocation11], 16  }
 0x116   :  { %240 = vsyncadd [#allocation11], 4294967280 }
 0x117   :  { %131 = vsyncpa [#allocation5], 1 }
 0x118   :  { %132 = vsyncpa [#allocation8], 1 }
 0x119   :  { %133 = vsyncpa [#allocation6], 1 }
 0x11a   :  { %134 = vsyncpa [#allocation11], 1 }

</bundles_post_ra>
